<compile_context>
chip_gen: v6e
topology: v6e:2x2x1
jax: 0.10.0
libtpu: 0.0.40
codegen_flags: <defaults>
</compile_context>

<pallas_src>
import functools

import jax
import jax.numpy as jnp
from jax import lax
from jax.experimental import pallas as pl
from jax.experimental.pallas import tpu as pltpu


def _mod_const(a, m):
    """a % m for a static positive int m (bitwise-and when m is a power of two)."""
    if m & (m - 1) == 0:
        return a & (m - 1)
    return a % m


def _shift_minor(x, s, n):
    """Circular shift along the minor (lane) axis: result[..., f] = x[..., (f + s) % n]."""
    s = s % n
    if s == 0:
        return x
    if n % 128 == 0:
        # XLU lane rotate: separate issue slot, no block-sized shifted copy.
        # pltpu.roll(x, k) == jnp.roll(x, k); we want jnp.roll(x, -s) == roll by n - s.
        return pltpu.roll(x, n - s, axis=x.ndim - 1)
    # Fallback for lane counts not aligned to 128 lanes: slice + wrap.
    # TODO(synk): pad W in the wrapper to keep the lane axis 128-aligned for such shapes.
    return jnp.concatenate([x[..., s:], x[..., :s]], axis=-1)


def _grad3d_diff_kernel_2d(x_ref, out_ref, *, D, H, W):
    """Fully flattened path (small D).

    x_ref:   VMEM (1, TBC, N)   with N = D*H*W on the lane axis.
    out_ref: VMEM (1, TBC, 3*N) laid out as [gx | gy | gd].
    """
    HW = H * W
    N = D * HW
    xf = x_ref[...].astype(jnp.float32)                     # (1, TBC, N)

    idx = lax.broadcasted_iota(jnp.int32, (1, 1, N), 2)     # tiny (1,1,N) row

    def shifted(s):
        return _shift_minor(xf, s, N)

    # ---- d/dx : +-1 lane shift, replicate at w == 0 / w == W-1 ----
    if W > 1:
        cw = _mod_const(idx, W)
        right = jnp.where(cw == W - 1, xf, shifted(1))
        left = jnp.where(cw == 0, xf, shifted(-1))
        gx = 0.5 * (right - left)
    else:
        gx = jnp.zeros_like(xf)

    # ---- d/dy : +-W lane shift, replicate at h == 0 / h == H-1 ----
    if H > 1:
        ch = _mod_const(idx, HW)
        up = jnp.where(ch >= HW - W, xf, shifted(W))
        down = jnp.where(ch < W, xf, shifted(-W))
        gy = 0.5 * (up - down)
    else:
        gy = jnp.zeros_like(xf)

    # ---- d/dz : +-H*W lane shift, replicate at d == 0 / d == D-1 ----
    if D > 1:
        front = jnp.where(idx >= N - HW, xf, shifted(HW))
        back = jnp.where(idx < HW, xf, shifted(-HW))
        gd = 0.5 * (front - back)
    else:
        gd = jnp.zeros_like(xf)

    out_ref[:, :, 0 * N:1 * N] = gx.astype(out_ref.dtype)
    out_ref[:, :, 1 * N:2 * N] = gy.astype(out_ref.dtype)
    out_ref[:, :, 2 * N:3 * N] = gd.astype(out_ref.dtype)


def _grad3d_diff_kernel_3d(x_ref, out_ref, *, D, H, W):
    """Large-D path.

    x_ref:   VMEM (TBC, D, HW)
    out_ref: VMEM (TBC, 3, D, HW)
    """
    HW = H * W
    xf = x_ref[...].astype(jnp.float32)                     # (TBC, D, HW)
    idx = lax.broadcasted_iota(jnp.int32, (1, 1, HW), 2)

    if W > 1:
        cw = _mod_const(idx, W)
        right = jnp.where(cw == W - 1, xf, _shift_minor(xf, 1, HW))
        left = jnp.where(cw == 0, xf, _shift_minor(xf, -1, HW))
        gx = 0.5 * (right - left)
    else:
        gx = jnp.zeros_like(xf)

    if H > 1:
        up = jnp.where(idx >= HW - W, xf, _shift_minor(xf, W, HW))
        down = jnp.where(idx < W, xf, _shift_minor(xf, -W, HW))
        gy = 0.5 * (up - down)
    else:
        gy = jnp.zeros_like(xf)

    if D > 1:
        # D is the sublane axis here: replicate edge via slices (proven lowering).
        # TODO(synk): could be a sublane pltpu.roll + mask; kept as slices for safety.
        d_p = jnp.concatenate([xf[:, 1:], xf[:, D - 1:]], axis=1)
        d_m = jnp.concatenate([xf[:, :1], xf[:, :D - 1]], axis=1)
        gd = 0.5 * (d_p - d_m)
    else:
        gd = jnp.zeros_like(xf)

    out_ref[:, 0, :, :] = gx.astype(out_ref.dtype)
    out_ref[:, 1, :, :] = gy.astype(out_ref.dtype)
    out_ref[:, 2, :, :] = gd.astype(out_ref.dtype)


def _choose_tbc(BC, footprint_bytes, budget_bytes):
    """Largest divisor of BC whose per-step footprint fits the VMEM budget, while
    keeping the parallel grid axis >= 2 (megacore / 2-TC v7x) and, when cheap,
    an even number of grid steps (2 TensorCores on v7x share the axis)."""
    divisors = [t for t in range(1, BC + 1) if BC % t == 0]
    fitting = [t for t in divisors if footprint_bytes(t) <= budget_bytes]
    if not fitting:
        return 1
    cand = [t for t in fitting if BC // t >= 2] or fitting
    best = max(cand)
    even = [t for t in cand if (BC // t) % 2 == 0]
    if even:
        best_even = max(even)
        if best_even * 2 >= best:   # prefer even grid unless it halves the tile
            return best_even
    return best


def spatial_gradient3d_pallas(x, mode="diff", order=1):
    """x: [B, C, D, H, W] -> [B, C, 3, D, H, W] (mode='diff', order=1)."""
    if mode != "diff" or order != 1:
        # TODO(synk): 'sobel' mode / order=2 use get_spatial_gradient_kernel3d + conv3d;
        # only the default diff/order=1 path is implemented here.
        raise NotImplementedError("only mode='diff', order=1 is implemented")

    B, C, D, H, W = x.shape
    BC, HW = B * C, H * W
    N = D * HW
    itemsize = jnp.dtype(x.dtype).itemsize

    # Sublane depth for the native dtype (8 for f32, 16 for bf16, 32 for int8):
    # below this, a (.., D, HW) layout wastes sublanes -> flatten fully instead.
    sublanes = max(1, (8 * 4) // itemsize)
    use_2d = D < sublanes

    def rup(a, m):
        return -(-a // m) * m

    # Per-step VMEM footprint: double-buffered input + double-buffered 3x output
    # + ~8 live f32 block-sized temporaries inside the body (conservative).
    if use_2d:
        def footprint(t):
            in_b = rup(t, 8) * rup(N, 128) * itemsize
            out_b = rup(t, 8) * rup(3 * N, 128) * itemsize
            tmp_b = 8 * rup(t, 8) * rup(N, 128) * 4
            return 2 * in_b + 2 * out_b + tmp_b
    else:
        def footprint(t):
            plane = rup(D, 8) * rup(HW, 128)
            in_b = t * plane * itemsize
            out_b = 3 * t * plane * itemsize
            tmp_b = 8 * t * plane * 4
            return 2 * in_b + 2 * out_b + tmp_b

    budget_bytes = 20 << 20   # keeps the whole pipeline well under v5e's 16 MiB default
    TBC = _choose_tbc(BC, footprint, budget_bytes)
    grid = (BC // TBC,)
    vmem_limit = int(min(32 << 20, max(footprint(TBC) * 3 // 2, 8 << 20)))

    # TODO(synk): volumes so large that even TBC=1 exceeds the budget would need an
    # H-strip tiling with halo rows; not implemented here.

    n_elem = B * C * N
    cost = pl.CostEstimate(
        flops=6 * n_elem,                      # 3 channels x (sub + mul)
        transcendentals=0,
        bytes_accessed=itemsize * n_elem * 4,  # read x once, write 3 channels
    )
    cparams = pltpu.CompilerParams(
        dimension_semantics=("parallel",),
        vmem_limit_bytes=vmem_limit,
    )

    if use_2d:
        G = grid[0]
        x_flat = x.reshape(G, TBC, N)
        kernel_fn = functools.partial(_grad3d_diff_kernel_2d, D=D, H=H, W=W)
        out_flat = pl.pallas_call(
            kernel_fn,
            out_shape=jax.ShapeDtypeStruct((G, TBC, 3 * N), x.dtype),
            grid_spec=pltpu.PrefetchScalarGridSpec(
                num_scalar_prefetch=0,
                grid=grid,
                in_specs=[pl.BlockSpec((1, TBC, N), lambda i: (i, 0, 0))],
                out_specs=pl.BlockSpec((1, TBC, 3 * N), lambda i: (i, 0, 0)),
            ),
            compiler_params=cparams,
            cost_estimate=cost,
        )(x_flat)
    else:
        x_flat = x.reshape(BC, D, HW)
        kernel_fn = functools.partial(_grad3d_diff_kernel_3d, D=D, H=H, W=W)
        out_flat = pl.pallas_call(
            kernel_fn,
            out_shape=jax.ShapeDtypeStruct((BC, 3, D, HW), x.dtype),
            grid_spec=pltpu.PrefetchScalarGridSpec(
                num_scalar_prefetch=0,
                grid=grid,
                in_specs=[pl.BlockSpec((TBC, D, HW), lambda i: (i, 0, 0))],
                out_specs=pl.BlockSpec((TBC, 3, D, HW), lambda i: (i, 0, 0, 0)),
            ),
            compiler_params=cparams,
            cost_estimate=cost,
        )(x_flat)

    # Metadata-only reshape back to [B, C, 3, D, H, W].
    return out_flat.reshape(B, C, 3, D, H, W)


def _reference_spatial_gradient3d(x):
    """Pure-JAX reference for mode='diff', order=1 (same math as the torch code)."""
    xp = jnp.pad(x, ((0, 0), (0, 0), (1, 1), (1, 1), (1, 1)), mode="edge")
    c = slice(1, -1)
    l = slice(0, -2)
    r = slice(2, None)
    gx = xp[..., c, c, r] - xp[..., c, c, l]
    gy = xp[..., c, r, c] - xp[..., c, l, c]
    gd = xp[..., r, c, c] - xp[..., l, c, c]
    return 0.5 * jnp.stack([gx, gy, gd], axis=2)


if __name__ == "__main__":
    key = jax.random.PRNGKey(0)
    B, C, D, H, W = 2, 4, 4, 16, 16
    x = jax.random.uniform(key, (B, C, D, H, W), dtype=jnp.float32)

    out = spatial_gradient3d_pallas(x, mode="diff", order=1)
    out = jax.block_until_ready(out)

    ref = _reference_spatial_gradient3d(x)
    assert out.shape == (B, C, 3, D, H, W)
    assert jnp.allclose(out, ref, atol=1e-5, rtol=1e-5)

    print("KERNEL_OK")
</pallas_src>

<mosaic_0001>
module attributes {stable_mosaic.version = 11 : i64} {
  func.func @_grad3d_diff_kernel_2d(%arg0: i32, %arg1: memref<1x4x1024xf32, #tpu.memory_space<vmem>>, %arg2: memref<1x4x3072xf32, #tpu.memory_space<vmem>>) attributes {dimension_semantics = [#tpu.dimension_semantics<parallel>], iteration_bounds = array<i64: 2>, scalar_prefetch = 0 : i64, scratch_operands = 0 : i64, tpu.core_type = #tpu.core_type<tc>, window_params = [{transform_indices = @transform_0, window_bounds = array<i64: 1, 4, 1024>}, {transform_indices = @transform_1, window_bounds = array<i64: 1, 4, 3072>}]} {
    %c0 = arith.constant 0 : index
    %c0_0 = arith.constant 0 : index
    %c0_1 = arith.constant 0 : index
    %0 = vector.load %arg1[%c0, %c0_0, %c0_1] : memref<1x4x1024xf32, #tpu.memory_space<vmem>>, vector<1x4x1024xf32>
    %1 = tpu.iota {dimensions = array<i32: 2>} : vector<1x1x1024xi32>
    %c15_i32 = arith.constant 15 : i32
    %2 = vector.broadcast %c15_i32 : i32 to vector<1x1x1024xi32>
    %3 = arith.andi %1, %2 : vector<1x1x1024xi32>
    %c15_i32_2 = arith.constant 15 : i32
    %4 = vector.broadcast %c15_i32_2 : i32 to vector<1x1x1024xi32>
    %5 = arith.cmpi eq, %3, %4 : vector<1x1x1024xi32>
    %c1023_i32 = arith.constant 1023 : i32
    %6 = tpu.dynamic_rotate %0 by %c1023_i32 dim 2 : vector<1x4x1024xf32>, i32 -> vector<1x4x1024xf32>
    %7 = vector.shape_cast %5 : vector<1x1x1024xi1> to vector<1x1x1024xi1>
    %8 = vector.broadcast %7 : vector<1x1x1024xi1> to vector<1x4x1024xi1>
    %9 = arith.select %8, %0, %6 : vector<1x4x1024xi1>, vector<1x4x1024xf32>
    %c0_i32 = arith.constant 0 : i32
    %10 = vector.broadcast %c0_i32 : i32 to vector<1x1x1024xi32>
    %11 = arith.cmpi eq, %3, %10 : vector<1x1x1024xi32>
    %c1_i32 = arith.constant 1 : i32
    %12 = tpu.dynamic_rotate %0 by %c1_i32 dim 2 : vector<1x4x1024xf32>, i32 -> vector<1x4x1024xf32>
    %13 = vector.shape_cast %11 : vector<1x1x1024xi1> to vector<1x1x1024xi1>
    %14 = vector.broadcast %13 : vector<1x1x1024xi1> to vector<1x4x1024xi1>
    %15 = arith.select %14, %0, %12 : vector<1x4x1024xi1>, vector<1x4x1024xf32>
    %16 = arith.subf %9, %15 : vector<1x4x1024xf32>
    %cst = arith.constant 5.000000e-01 : f32
    %17 = vector.broadcast %cst : f32 to vector<1x4x1024xf32>
    %18 = arith.mulf %17, %16 : vector<1x4x1024xf32>
    %c255_i32 = arith.constant 255 : i32
    %19 = vector.broadcast %c255_i32 : i32 to vector<1x1x1024xi32>
    %20 = arith.andi %1, %19 : vector<1x1x1024xi32>
    %c240_i32 = arith.constant 240 : i32
    %21 = vector.broadcast %c240_i32 : i32 to vector<1x1x1024xi32>
    %22 = arith.cmpi sge, %20, %21 : vector<1x1x1024xi32>
    %c1008_i32 = arith.constant 1008 : i32
    %23 = tpu.dynamic_rotate %0 by %c1008_i32 dim 2 : vector<1x4x1024xf32>, i32 -> vector<1x4x1024xf32>
    %24 = vector.shape_cast %22 : vector<1x1x1024xi1> to vector<1x1x1024xi1>
    %25 = vector.broadcast %24 : vector<1x1x1024xi1> to vector<1x4x1024xi1>
    %26 = arith.select %25, %0, %23 : vector<1x4x1024xi1>, vector<1x4x1024xf32>
    %c16_i32 = arith.constant 16 : i32
    %27 = vector.broadcast %c16_i32 : i32 to vector<1x1x1024xi32>
    %28 = arith.cmpi slt, %20, %27 : vector<1x1x1024xi32>
    %c16_i32_3 = arith.constant 16 : i32
    %29 = tpu.dynamic_rotate %0 by %c16_i32_3 dim 2 : vector<1x4x1024xf32>, i32 -> vector<1x4x1024xf32>
    %30 = vector.shape_cast %28 : vector<1x1x1024xi1> to vector<1x1x1024xi1>
    %31 = vector.broadcast %30 : vector<1x1x1024xi1> to vector<1x4x1024xi1>
    %32 = arith.select %31, %0, %29 : vector<1x4x1024xi1>, vector<1x4x1024xf32>
    %33 = arith.subf %26, %32 : vector<1x4x1024xf32>
    %cst_4 = arith.constant 5.000000e-01 : f32
    %34 = vector.broadcast %cst_4 : f32 to vector<1x4x1024xf32>
    %35 = arith.mulf %34, %33 : vector<1x4x1024xf32>
    %c768_i32 = arith.constant 768 : i32
    %36 = vector.broadcast %c768_i32 : i32 to vector<1x1x1024xi32>
    %37 = arith.cmpi sge, %1, %36 : vector<1x1x1024xi32>
    %c768_i32_5 = arith.constant 768 : i32
    %38 = tpu.dynamic_rotate %0 by %c768_i32_5 dim 2 : vector<1x4x1024xf32>, i32 -> vector<1x4x1024xf32>
    %39 = vector.shape_cast %37 : vector<1x1x1024xi1> to vector<1x1x1024xi1>
    %40 = vector.broadcast %39 : vector<1x1x1024xi1> to vector<1x4x1024xi1>
    %41 = arith.select %40, %0, %38 : vector<1x4x1024xi1>, vector<1x4x1024xf32>
    %c256_i32 = arith.constant 256 : i32
    %42 = vector.broadcast %c256_i32 : i32 to vector<1x1x1024xi32>
    %43 = arith.cmpi slt, %1, %42 : vector<1x1x1024xi32>
    %c256_i32_6 = arith.constant 256 : i32
    %44 = tpu.dynamic_rotate %0 by %c256_i32_6 dim 2 : vector<1x4x1024xf32>, i32 -> vector<1x4x1024xf32>
    %45 = vector.shape_cast %43 : vector<1x1x1024xi1> to vector<1x1x1024xi1>
    %46 = vector.broadcast %45 : vector<1x1x1024xi1> to vector<1x4x1024xi1>
    %47 = arith.select %46, %0, %44 : vector<1x4x1024xi1>, vector<1x4x1024xf32>
    %48 = arith.subf %41, %47 : vector<1x4x1024xf32>
    %cst_7 = arith.constant 5.000000e-01 : f32
    %49 = vector.broadcast %cst_7 : f32 to vector<1x4x1024xf32>
    %50 = arith.mulf %49, %48 : vector<1x4x1024xf32>
    %c0_8 = arith.constant 0 : index
    %c0_9 = arith.constant 0 : index
    %c0_10 = arith.constant 0 : index
    %51 = vector.load %arg2[%c0_8, %c0_9, %c0_10] : memref<1x4x3072xf32, #tpu.memory_space<vmem>>, vector<1x4x1024xf32>
    tpu.vector_store %arg2[%c0_8, %c0_9, %c0_10], %18 {strides = array<i32>} : memref<1x4x3072xf32, #tpu.memory_space<vmem>>, vector<1x4x1024xf32>,
    %c0_11 = arith.constant 0 : index
    %c0_12 = arith.constant 0 : index
    %c1024 = arith.constant 1024 : index
    %52 = vector.load %arg2[%c0_11, %c0_12, %c1024] : memref<1x4x3072xf32, #tpu.memory_space<vmem>>, vector<1x4x1024xf32>
    tpu.vector_store %arg2[%c0_11, %c0_12, %c1024], %35 {strides = array<i32>} : memref<1x4x3072xf32, #tpu.memory_space<vmem>>, vector<1x4x1024xf32>,
    %c0_13 = arith.constant 0 : index
    %c0_14 = arith.constant 0 : index
    %c2048 = arith.constant 2048 : index
    %53 = vector.load %arg2[%c0_13, %c0_14, %c2048] : memref<1x4x3072xf32, #tpu.memory_space<vmem>>, vector<1x4x1024xf32>
    tpu.vector_store %arg2[%c0_13, %c0_14, %c2048], %50 {strides = array<i32>} : memref<1x4x3072xf32, #tpu.memory_space<vmem>>, vector<1x4x1024xf32>,
    return
  }
  func.func @transform_0(%arg0: i32) -> (i32, i32, i32) {
    %c0_i32 = arith.constant 0 : i32
    %c0_i32_0 = arith.constant 0 : i32
    %c0_i32_1 = arith.constant 0 : i32
    return %arg0, %c0_i32, %c0_i32_0 : i32, i32, i32
  }
  func.func @transform_1(%arg0: i32) -> (i32, i32, i32) {
    %c0_i32 = arith.constant 0 : i32
    %c0_i32_0 = arith.constant 0 : i32
    %c0_i32_1 = arith.constant 0 : i32
    return %arg0, %c0_i32, %c0_i32_0 : i32, i32, i32
  }
}

</mosaic_0001>

<bundles_post_ra>
// kernel: tpu_custom_call.1
= control target key start
LH: loop header
LB: loop body
LE: loop exit
PB: predicated region body
PF: predicated region fallthrough
CT: control target
= control target key end

     0   :  { %6 = vsyncpa [#allocation3], 0  ;;  %s1343_s0 = inlined_call_operand.hbm [shape: f32[2,4,1024], index: 0, kind: input, shape index: {}]   ;;  %s1344_s1 = inlined_call_operand.hbm [shape: f32[2,4,3072], index: 1, kind: output, shape index: {}]  }
   0x1   :  { %8 = vsyncpa [#allocation3 + $0x1], 0 }
   0x2   :  { %9 = vsyncpa [#allocation4], 0 }
   0x3   :  { %11 = vsyncpa [#allocation4 + $0x1], 0  ;;  %s837_s6 = smov 0   ;;  %s839_s7 = smov 0  }
   0x4   :  { %s841_s8 = smov 0   ;;  %s843_s9 = smov 0  }
   0x5 LB: > { %s858_s10 = sadd.s32 4294967295, %s819_s9   ;;  %s659_s11 = sadd.s32 4294967294, %s819_s9   ;;  %s819_s9 = sphi %s843_s9, %s1416_s9   ;;  %s815_s8 = sphi %s841_s8, %s1415_s8   ;;  %s811_s7 = sphi %s839_s7, %s1414_s7   ;;  %s807_s6 = sphi %s837_s6, %s1413_s6  }
   0x6   : > { %s862_s12 = sadd.s32 1, %s819_s9   ;;  %s24_s13 = sadd.s32 1, %s815_s8 }
   0x7   : > { %s21_s14 = ssub.s32 %s819_s9, %s862_s12  ;;  %p31_p0 = scmp.ne.s32.totalorder %s815_s8, %s811_s7 }
   0x8   : > { %p22_p1 = scmp.eq.s32.totalorder %s21_s14, 0  ;;  %p32_p2 = scmp.eq.s32.totalorder %s819_s9, 0 }
   0x9   : > { %p37_p3 = scmp.ne.s32.totalorder %s811_s7, %s807_s6  ;;  %p38_p4 = scmp.eq.s32.totalorder %s858_s10, 0 }
   0xa   : > { %s874_s15 = scalar_select %p22_p1, %s815_s8, %s24_s13  }
   0xb   : > { %p876_p5 = por %p32_p2, %p31_p0  ;;  %p880_p6 = por %p38_p4, %p37_p3 }
   0xc   : > { %p61_p7 = scmp.eq.s32.totalorder %s858_s10, 1  ;;  %p67_p8 = scmp.eq.s32.totalorder %s659_s11, 1 }
   0xd   : > { %s1348_s17 = scalar_select %p880_p6, 1, 0 }
   0xe   : > { %p685_p10 = scmp.lt.s32.totalorder %s819_s9, 2  ;;  %p887_p11 = por %p61_p7, %p31_p0 }
   0xf   : > { %p891_p12 = por %p67_p8, %p37_p3  ;;  %s87_s20 = sand.u32 1, %s815_s8  }
  0x10   : > { %s1349_s18 = scalar_select %p887_p11, 1, 0 }
  0x11   : > { %s1350_s19 = scalar_select %p891_p12, 1, 0 }
  0x12   : > { %s670_s21 = sshll.u32 %s819_s9, 9  ;;  %s662_s22 = sshll.u32 %s87_s20, 5 }
  0x13   : > { %s900_s25 = scalar_lea.hbm %s1343_s0, %s670_s21  ;;  %s91_s26 = scalar_lea.vmem [#allocation2], %s662_s22 }
  0x14   : > { %s99_s27 = sshll.u32 %s91_s26, 4  ;;  %p904_p13 = pnand %p685_p10, %p876_p5  ;;  %s908_s27 = int_to_ptr.vmem [resolvable:$true] %s99_s27 }
  0x15   : > { %s88_s29 = scalar_lea.sflag [#allocation3], %s87_s20  ;;  %s727_s30 = scalar_lea.hbm %s900_s25, 512 }
  0x16   : > { %p728_p2 = scmp.ne.s32.totalorder %s900_s25, %s727_s30  ;;  %p729_p3 = pneg %p904_p13 }
  0x17   : > { %s732_s4 = scalar_lea.hbm %s1343_s0, 1024  ;;  %p733_p5 = scmp.lt.s32.totalorder %s900_s25, %s1343_s0 }
  0x18   : > { %p730_p4 = pnand %p729_p3, %p728_p2  ;;  %p734_p8 = scmp.lt.s32.totalorder %s732_s4, %s727_s30 }
  0x1a   : > { %p731_p7 = pneg %p730_p4  ;;  %p735_p10 = por %p734_p8, %p733_p5 }
  0x1c   : > { %p736_p9 = pnand %p735_p10, %p731_p7 }
  0x1e   : > { %739 = shalt.err (!%p736_p9)
}
  0x1f   : > { %s740_s13 = scalar_lea.vmem %s908_s27, 512  ;;  %s821_s14 = smov [#allocation2]  }
  0x20   : > { %p741_p0 = scmp.ne.s32.totalorder %s908_s27, %s740_s13  ;;  %s745_s16 = sshll.u32 %s821_s14, 4  ;;  %s746_s16 = int_to_ptr.vmem [resolvable:$false] %s745_s16 }
  0x21   : > { %s747_s20 = scalar_lea.vmem %s746_s16, 1024  ;;  %p748_p4 = scmp.lt.s32.totalorder %s908_s27, %s746_s16 }
  0x22   : > { %p743_p1 = pnand %p741_p0, %p729_p3  ;;  %p749_p12 = scmp.lt.s32.totalorder %s747_s20, %s740_s13 }
  0x24   : > { %p744_p2 = pneg %p743_p1  ;;  %p750_p11 = por %p749_p12, %p748_p4 }
  0x26   : > { %p751_p6 = pnand %p750_p11, %p744_p2 }
  0x28   : > { %754 = shalt.err (!%p751_p6)
}
  0x29   : > { %680 = dma.hbm_to_vmem [thread:$0]  (!%p904_p13), %s900_s25, 512, %s908_s27, %s88_s29  }
  0x2a   : > { %p1352_p9 = scmp.lt.s32.totalorder %s819_s9, 3  ;;  %p1353_p7 = scmp.ge.s32.totalorder %s819_s9, 1 }
  0x2c   : > { %p105_p0 = pnand %p1353_p7, %p1352_p9 }
  0x2d   : > { %s935_s21 = sand.u32 (!%p105_p0), 1, %s811_s7   ;;  %p1354_p6 = scmp.ne.s32.totalorder (!%p105_p0), %s1348_s17, 0 }
  0x2e   : > { %108 = sbr.rel (%p105_p0) target bundleno = 249 (0xf9), region = 24  ;;  %s666_s22 = sshll.u32 (!%p105_p0), %s935_s21, 5 }
  0x2f   : > { %s111_s23 = scalar_lea.sflag (!%p105_p0), [#allocation3], %s935_s21  ;;  %s114_s24 = scalar_lea.vmem (!%p105_p0), [#allocation2], %s666_s22 }
  0x33   : > { %798 = dma.done.wait (%p1354_p6), %s111_s23, 512  }
  0x34   : > { %800 = vsyncadd (%p1354_p6), %s111_s23, 4294966784  ;;  %v943_v0 = vld [vmem:[%s114_s24 + $0x8] sm:$0xff]  ;;  %v945_v1 = vld [vmem:[%s114_s24] sm:$0xff]  ;;  %s822_s25 = smov 127   ;;  %s823_s17 = smov 1   ;;  %v137_v30 = vlaneseq  ;;  %v1361_v58 = vmov 0 }
  0x35   : > { %178 = vrot.lane.b32.xlu1 %v943_v0, %s822_s25  ;;  %174 = vrot.lane.b32.xlu0 %v945_v1, %s822_s25  ;;  %v951_v2 = vcombine.high %v943_v0, %v943_v0  ;;  %v953_v3 = vld [vmem:[%s114_s24 + $0x10] sm:$0xff]  ;;  %v963_v5 = vcombine.high %v945_v1, %v945_v1  ;;  %v965_v6 = vld [vmem:[%s114_s24 + $0x18] sm:$0xff]  ;;  %s824_s26 = smov 112   ;;  %v498_v9 = vsub.f32 %v943_v0, %v945_v1  ;;  %s825_s27 = smov 16   ;;  %v1365_v60 = vmov 0 }
  0x36   : > { %v959_v4 = vcombine.high %v953_v3, %v953_v3  ;;  %v971_v7 = vcombine.high %v965_v6, %v965_v6  ;;  %v502_v8 = vsub.f32 %v965_v6, %v943_v0  ;;  %v504_v10 = vsub.f32 %v965_v6, %v953_v3  ;;  %s671_s28 = smul.u32 96, %s935_s21  ;;  %s575_s11 = scalar_lea.sflag [#allocation4], %s935_s21 }
  0x37   : > { %v500_v11 = vsub.f32 %v953_v3, %v945_v1  ;;  %v506_v13 = vmul.f32 0.5, %v498_v9  ;;  %v499_v16 = vsub.f32 %v951_v2, %v963_v5  ;;  %v1022_v33 = vand.u32 127, %v137_v30  ;;  %s672_s30 = smul.u32 1536, %s858_s10  ;;  %p1410_p12 = scmp.ne.s32.totalorder %s1349_s18, 0 }
  0x38   : > { %v510_v12 = vmul.f32 0.5, %v502_v8  ;;  %v512_v14 = vmul.f32 0.5, %v504_v10  ;;  %v501_v17 = vsub.f32 %v959_v4, %v963_v5  ;;  %v503_v18 = vsub.f32 %v971_v7, %v951_v2  ;;  %s1014_s29 = scalar_lea.vmem [#allocation5], %s671_s28  ;;  %s826_s10 = smov [#allocation5]  }
  0x39   : > { %180 = vrot.lane.b32.xlu1 %v951_v2, %s822_s25  ;;  %182 = vrot.lane.b32.xlu0 %v953_v3, %s822_s25  ;;  %v508_v15 = vmul.f32 0.5, %v500_v11  ;;  %v505_v19 = vsub.f32 %v971_v7, %v959_v4  ;;  %v507_v20 = vmul.f32 0.5, %v499_v16  ;;  %v1025_v36 = vadd.s32 256, %v1022_v33  ;;  %s589_s2 = sshll.u32 %s1014_s29, 4  ;;  %s1304_s5 = scalar_lea.hbm %s1344_s1, %s672_s30  ;;  %s590_s2 = int_to_ptr.vmem [resolvable:$true] %s589_s2 }
  0x3a   : > { %v509_v21 = vmul.f32 0.5, %v501_v17  ;;  %v511_v22 = vmul.f32 0.5, %v503_v18  ;;  %v1028_v37 = vadd.s32 384, %v1022_v33  ;;  %v1031_v38 = vadd.s32 512, %v1022_v33  ;;  %s755_s13 = scalar_lea.vmem %s590_s2, 1536  ;;  %s759_s14 = sshll.u32 %s826_s10, 4  ;;  %s760_s14 = int_to_ptr.vmem [resolvable:$false] %s759_s14 }
  0x3b   : > { %v513_v23 = vmul.f32 0.5, %v505_v19  ;;  %v562_v24 = vcombine.low %v506_v13, %v507_v20  ;;  %v1034_v39 = vadd.s32 128, %v1022_v33  ;;  %v1037_v40 = vadd.s32 896, %v1022_v33  ;;  %p756_p11 = scmp.ne.s32.totalorder %s590_s2, %s755_s13  ;;  %s761_s16 = scalar_lea.vmem %s760_s14, 3072 }
  0x3c   : > { %v563_v25 = vcombine.low %v508_v15, %v509_v21  ;;  %v564_v26 = vcombine.low %v510_v12, %v511_v22  ;;  %v1040_v41 = vadd.s32 640, %v1022_v33  ;;  %v1043_v42 = vadd.s32 768, %v1022_v33  ;;  %p762_p3 = scmp.lt.s32.totalorder %s590_s2, %s760_s14  ;;  %p763_p5 = scmp.lt.s32.totalorder %s761_s16, %s755_s13 }
  0x3d   : > { %184 = vrot.lane.b32.xlu1 %v959_v4, %s822_s25  ;;  %176 = vrot.lane.b32.xlu0 %v963_v5, %s822_s25  ;;  %v565_v27 = vcombine.low %v512_v14, %v513_v23  ;;  %570 = vst [vmem:[%s1014_s29 + $0x40] sm:$0xff] %v562_v24  ;;  %v146_v43 = vand.u32 15, %v1022_v33  ;;  %v148_v46 = vand.u32 15, %v1025_v36  ;;  %v149_v47 = vand.u32 15, %v1028_v37  ;;  %p757_p13 = pnand %p756_p11, %p1410_p12 }
  0x3e   : > { %571 = vst [vmem:[%s1014_s29 + $0x48] sm:$0xff] %v563_v25  ;;  %572 = vst [vmem:[%s1014_s29 + $0x50] sm:$0xff] %v564_v26  ;;  %v150_v48 = vand.u32 15, %v1031_v38  ;;  %v147_v49 = vand.u32 15, %v1034_v39  ;;  %v153_v50 = vand.u32 15, %v1037_v40  ;;  %v151_v51 = vand.u32 15, %v1040_v41  ;;  %p764_p8 = por %p763_p5, %p762_p3 }
  0x3f   : > { %573 = vst [vmem:[%s1014_s29 + $0x58] sm:$0xff] %v565_v27  ;;  %v152_v52 = vand.u32 15, %v1043_v42  ;;  %vm190_vm0 = vcmp.lt.s32.totalorder %v1022_v33, 127  ;;  %vm1054_vm1 = vcmp.eq.s32.totalorder %v148_v46, 15  ;;  %vm1058_vm2 = vcmp.eq.s32.totalorder %v149_v47, 15  ;;  %p758_p1 = pneg %p757_p13 }
  0x40   : > { %vm1062_vm3 = vcmp.eq.s32.totalorder %v150_v48, 15  ;;  %vm1066_vm4 = vcmp.eq.s32.totalorder %v146_v43, 15  ;;  %vm1070_vm5 = vcmp.eq.s32.totalorder %v147_v49, 15  ;;  %vm1074_vm6 = vcmp.eq.s32.totalorder %v153_v50, 15 }
  0x41   : > { %188 = vrot.lane.b32.xlu1 %v971_v7, %s822_s25  ;;  %186 = vrot.lane.b32.xlu0 %v965_v6, %s822_s25  ;;  %v1362_v58 = vsel %vm1066_vm4, 4294967295, %v1361_v58  ;;  %v1366_v60 = vsel %vm1074_vm6, 4294967295, %v1365_v60  ;;  %vm1078_vm7 = vcmp.eq.s32.totalorder %v151_v51, 15  ;;  %vm1082_vm8 = vcmp.eq.s32.totalorder %v147_v49, 0  ;;  %p765_p10 = pnand %p764_p8, %p758_p1 }
  0x42   : > { %vm1091_vm10 = vcmp.eq.s32.totalorder %v152_v52, 15  ;;  %v1371_v9 = vmov 0  ;;  %vm1095_vm11 = vcmp.eq.s32.totalorder %v148_v46, 0  ;;  %vm1099_vm12 = vcmp.eq.s32.totalorder %v149_v47, 0 }
  0x43   : > { %v1372_v9 = vsel %vm1091_vm10, 4294967295, %v1371_v9  ;;  %vm1103_vm13 = vcmp.eq.s32.totalorder %v150_v48, 0  ;;  %vm1107_vm14 = vcmp.eq.s32.totalorder %v151_v51, 0  ;;  %vm1111_vm15 = vcmp.eq.s32.totalorder %v146_v43, 0 }
  0x44   : > { %vm1115_vm9 = vcmp.eq.s32.totalorder %v153_v50, 0  ;;  %vm1385_vm10 = vcmp.lt.s32.totalorder %v1022_v33, 1 }
  0x45   : > { %233 = vrot.lane.b32.xlu1 %v963_v5, %s823_s17  ;;  %231 = vrot.lane.b32.xlu0 %v945_v1, %s823_s17  ;;  %vm1386_vm6 = vmmov %vm1385_vm10 }
  0x46   : > { %vm1387_vm4 = vmmov %vm1386_vm6 }
  0x49   : > { %237 = vrot.lane.b32.xlu1 %v951_v2, %s823_s17  ;;  %235 = vrot.lane.b32.xlu0 %v943_v0, %s823_s17 }
  0x4d   : > { %241 = vrot.lane.b32.xlu1 %v959_v4, %s823_s17  ;;  %239 = vrot.lane.b32.xlu0 %v953_v3, %s823_s17 }
  0x51   : > { %245 = vrot.lane.b32.xlu1 %v971_v7, %s823_s17  ;;  %243 = vrot.lane.b32.xlu0 %v965_v6, %s823_s17 }
  0x55   : > { %314 = vrot.lane.b32.xlu1 %v963_v5, %s824_s26  ;;  %312 = vrot.lane.b32.xlu0 %v945_v1, %s824_s26 }
  0x59   : > { %318 = vrot.lane.b32.xlu1 %v951_v2, %s824_s26  ;;  %316 = vrot.lane.b32.xlu0 %v943_v0, %s824_s26 }
  0x5d   : > { %322 = vrot.lane.b32.xlu1 %v959_v4, %s824_s26  ;;  %320 = vrot.lane.b32.xlu0 %v953_v3, %s824_s26 }
  0x61   : > { %326 = vrot.lane.b32.xlu1 %v971_v7, %s824_s26  ;;  %324 = vrot.lane.b32.xlu0 %v965_v6, %s824_s26 }
  0x65   : > { %371 = vrot.lane.b32.xlu1 %v963_v5, %s825_s27  ;;  %369 = vrot.lane.b32.xlu0 %v945_v1, %s825_s27 }
  0x69   : > { %375 = vrot.lane.b32.xlu1 %v951_v2, %s825_s27  ;;  %373 = vrot.lane.b32.xlu0 %v943_v0, %s825_s27 }
  0x6d   : > { %379 = vrot.lane.b32.xlu1 %v959_v4, %s825_s27  ;;  %377 = vrot.lane.b32.xlu0 %v953_v3, %s825_s27 }
  0x71   : > { %383 = vrot.lane.b32.xlu1 %v971_v7, %s825_s27  ;;  %381 = vrot.lane.b32.xlu0 %v965_v6, %s825_s27 }
  0xa7   : > { %v179_v28 = vpop.permute.xlu1 %178  ;;  %v175_v29 = vpop.permute.xlu0 %174 }
  0xab   : > { %v181_v31 = vpop.permute.xlu1 %180  ;;  %v183_v32 = vpop.permute.xlu0 %182 }
  0xac   : > { %v195_v63 = vsel %vm190_vm0, %v179_v28, %v181_v31  ;;  %v194_v8 = vsel %vm190_vm0, %v181_v31, %v183_v32 }
  0xad   : > { %v217_v22 = vsel %vm1054_vm1, %v943_v0, %v195_v63  ;;  %v218_v23 = vsel %vm1058_vm2, %v951_v2, %v194_v8  ;;  %vm1388_vm1 = vmmov %vm1387_vm4 }
  0xae   : > { %vm1389_vm2 = vmmov %vm1388_vm1 }
  0xaf   : > { %v185_v34 = vpop.permute.xlu1 %184  ;;  %v177_v35 = vpop.permute.xlu0 %176 }
  0xb0   : > { %v193_v18 = vsel %vm190_vm0, %v183_v32, %v185_v34  ;;  %v196_v26 = vsel %vm190_vm0, %v177_v35, %v179_v28  ;;  %v197_v43 = vsel %vm190_vm0, %v175_v29, %v177_v35 }
  0xb1   : > { %v219_v32 = vsel %vm1062_vm3, %v953_v3, %v193_v18  ;;  %v216_v35 = vsel %vm1070_vm5, %v963_v5, %v196_v26  ;;  %vm1390_vm3 = vnez %v1362_v58  ;;  %vm229_vm5 = vcmp.eq.s32.totalorder %v152_v52, 0 }
  0xb2   : > { %v215_v59 = vsel %vm1390_vm3, %v945_v1, %v197_v43 }
  0xb3   : > { %v189_v44 = vpop.permute.xlu1 %188  ;;  %v187_v45 = vpop.permute.xlu0 %186 }
  0xb4   : > { %v192_v27 = vsel %vm190_vm0, %v185_v34, %v187_v45  ;;  %v198_v46 = vsel %vm190_vm0, %v189_v44, %v175_v29  ;;  %v191_v56 = vsel %vm190_vm0, %v187_v45, %v189_v44  ;;  %vm1392_vm0 = vmmov %vm1388_vm1 }
  0xb5   : > { %v220_v29 = vsel %vm1078_vm7, %v959_v4, %v192_v27  ;;  %vm1394_vm7 = vnez %v1372_v9 }
  0xb6   : > { %v221_v58 = vsel %vm1394_vm7, %v965_v6, %v191_v56 }
  0xb7   : > { %v234_v53 = vpop.permute.xlu1 %233  ;;  %v232_v54 = vpop.permute.xlu0 %231 }
  0xb8   : > { %v254_v19 = vsel %vm1385_vm10, %v232_v54, %v234_v53 }
  0xb9   : > { %v273_v47 = vsel %vm1082_vm8, %v963_v5, %v254_v19  ;;  %vm1395_vm8 = vmmov %vm1392_vm0 }
  0xba   : > { %v281_v8 = vsub.f32 %v216_v35, %v273_v47  ;;  %v298_v47 = vand.u32 255, %v1025_v36  ;;  %v303_v36 = vand.u32 255, %v1037_v40 }
  0xbb   : > { %v238_v12 = vpop.permute.xlu1 %237  ;;  %v236_v13 = vpop.permute.xlu0 %235 }
  0xbc   : > { %v252_v20 = vsel %vm1386_vm6, %v236_v13, %v238_v12  ;;  %v253_v21 = vsel %vm1387_vm4, %v234_v53, %v236_v13  ;;  %vm1391_vm4 = vnez %v1366_v60  ;;  %vm1393_vm6 = vmmov %vm1392_vm0  ;;  %v289_v16 = vmul.f32 0.5, %v281_v8 }
  0xbd   : > { %v274_v24 = vsel %vm1095_vm11, %v943_v0, %v253_v21  ;;  %v275_v25 = vsel %vm1099_vm12, %v951_v2, %v252_v20  ;;  %v222_v61 = vsel %vm1391_vm4, %v971_v7, %v198_v46  ;;  %v299_v46 = vand.u32 255, %v1028_v37 }
  0xbe   : > { %v282_v30 = vsub.f32 %v217_v22, %v274_v24  ;;  %v283_v31 = vsub.f32 %v218_v23, %v275_v25  ;;  %vm1208_vm11 = vcmp.lt.s32.totalorder %v298_v47, 16  ;;  %v300_v37 = vand.u32 255, %v1031_v38 }
  0xbf   : > { %v242_v28 = vpop.permute.xlu1 %241  ;;  %v240_v48 = vpop.permute.xlu0 %239  ;;  %vm307_vm10 = vcmp.ge.s32.totalorder %v299_v46, 240 }
  0xc0   : > { %v290_v49 = vmul.f32 0.5, %v282_v30  ;;  %v291_v34 = vmul.f32 0.5, %v283_v31  ;;  %v250_v50 = vsel %vm1388_vm1, %v240_v48, %v242_v28  ;;  %v251_v51 = vsel %vm1389_vm2, %v238_v12, %v240_v48 }
  0xc1   : > { %v276_v53 = vsel %vm1103_vm13, %v953_v3, %v251_v51  ;;  %v277_v55 = vsel %vm1107_vm14, %v959_v4, %v250_v50  ;;  %v297_v48 = vand.u32 255, %v1034_v39  ;;  %vm385_vm13 = vcmp.lt.s32.totalorder %v1022_v33, 16 }
  0xc2   : > { %v523_v57 = vcombine.low %v290_v49, %v291_v34  ;;  %v284_v62 = vsub.f32 %v219_v32, %v276_v53  ;;  %v285_v63 = vsub.f32 %v220_v29, %v277_v55  ;;  %v301_v34 = vand.u32 255, %v1040_v41 }
  0xc3   : > { %v246_v10 = vpop.permute.xlu1 %245  ;;  %v244_v11 = vpop.permute.xlu0 %243  ;;  %vm1214_vm12 = vcmp.ge.s32.totalorder %v297_v48, 240  ;;  %vm1241_vm1 = vcmp.ge.s32.totalorder %v303_v36, 240 }
  0xc4   : > { %531 = vst [vmem:[%s1014_s29 + $0x8] sm:$0xff] %v523_v57  ;;  %v292_v12 = vmul.f32 0.5, %v284_v62  ;;  %v293_v13 = vmul.f32 0.5, %v285_v63  ;;  %v255_v44 = vsel %vm1392_vm0, %v246_v10, %v232_v54  ;;  %v248_v45 = vsel %vm1393_vm6, %v244_v11, %v246_v10 }
  0xc5   : > { %v272_v60 = vsel %vm1111_vm15, %v945_v1, %v255_v44  ;;  %v249_v52 = vsel %vm1395_vm8, %v242_v28, %v244_v11  ;;  %v279_v14 = vsel %vm1115_vm9, %v971_v7, %v248_v45  ;;  %vm328_vm9 = vcmp.lt.s32.totalorder %v1022_v33, 112 }
  0xc6   : > { %v524_v15 = vcombine.low %v292_v12, %v293_v13  ;;  %v280_v54 = vsub.f32 %v215_v59, %v272_v60  ;;  %v278_v18 = vsel %vm229_vm5, %v965_v6, %v249_v52  ;;  %v287_v19 = vsub.f32 %v222_v61, %v279_v14 }
  0xc7   : > { %v286_v9 = vsub.f32 %v221_v58, %v278_v18  ;;  %v1194_v20 = vpop.permute.xlu1 %314  ;;  %v1196_v21 = vpop.permute.xlu0 %312  ;;  %vm1219_vm14 = vcmp.ge.s32.totalorder %v301_v34, 240  ;;  %v296_v63 = vand.u32 255, %v1022_v33  ;;  %vm1236_vm15 = vcmp.lt.s32.totalorder %v300_v37, 16 }
  0xc8   : > { %532 = vst [vmem:[%s1014_s29 + $0x10] sm:$0xff] %v524_v15  ;;  %v288_v22 = vmul.f32 0.5, %v280_v54  ;;  %v295_v23 = vmul.f32 0.5, %v287_v19 }
  0xc9   : > { %v294_v24 = vmul.f32 0.5, %v286_v9  ;;  %vm1265_vm2 = vcmp.lt.s32.totalorder %v296_v63, 16 }
  0xca   : > { %v522_v25 = vcombine.low %v288_v22, %v289_v16 }
  0xcb   : > { %v525_v17 = vcombine.low %v294_v24, %v295_v23  ;;  %v319_v26 = vpop.permute.xlu1 %318  ;;  %v317_v27 = vpop.permute.xlu0 %316 }
  0xcc   : > { %530 = vst [vmem:[%s1014_s29] sm:$0xff] %v522_v25  ;;  %v333_v56 = vsel %vm328_vm9, %v317_v27, %v319_v26  ;;  %v334_v10 = vsel %vm328_vm9, %v1194_v20, %v317_v27 }
  0xcd   : > { %533 = vst [vmem:[%s1014_s29 + $0x18] sm:$0xff] %v525_v17  ;;  %v354_v54 = vsel %vm1214_vm12, %v963_v5, %v334_v10 }
  0xcf   : > { %v323_v30 = vpop.permute.xlu1 %322  ;;  %v321_v31 = vpop.permute.xlu0 %320 }
  0xd0   : > { %v332_v50 = vsel %vm328_vm9, %v319_v26, %v321_v31  ;;  %v331_v52 = vsel %vm328_vm9, %v321_v31, %v323_v30 }
  0xd1   : > { %v356_v55 = vsel %vm307_vm10, %v951_v2, %v332_v50  ;;  %v302_v2 = vand.u32 255, %v1043_v42 }
  0xd3   : > { %v327_v32 = vpop.permute.xlu1 %326  ;;  %v325_v43 = vpop.permute.xlu0 %324  ;;  %vm1272_vm3 = vcmp.lt.s32.totalorder %v302_v2, 16 }
  0xd4   : > { %v330_v53 = vsel %vm328_vm9, %v323_v30, %v325_v43 }
  0xd5   : > { %v358_v13 = vsel %vm1219_vm14, %v959_v4, %v330_v53 }
  0xd7   : > { %v372_v28 = vpop.permute.xlu1 %371  ;;  %v370_v49 = vpop.permute.xlu0 %369 }
  0xd8   : > { %v392_v42 = vsel %vm385_vm13, %v370_v49, %v372_v28 }
  0xd9   : > { %v419_v16 = vsub.f32 %v354_v54, %v392_v42 }
  0xdb   : > { %v376_v39 = vpop.permute.xlu1 %375  ;;  %v374_v41 = vpop.permute.xlu0 %373  ;;  %v427_v33 = vmul.f32 0.5, %v419_v16 }
  0xdc   : > { %v390_v38 = vsel %vm385_vm13, %v374_v41, %v376_v39  ;;  %v391_v40 = vsel %vm385_vm13, %v372_v28, %v374_v41 }
  0xdd   : > { %v412_v57 = vsel %vm1208_vm11, %v943_v0, %v391_v40  ;;  %v421_v62 = vsub.f32 %v356_v55, %v390_v38  ;;  %v336_v0 = vsel %vm328_vm9, %v327_v32, %v1196_v21 }
  0xde   : > { %v420_v59 = vsub.f32 %v333_v56, %v412_v57  ;;  %v360_v24 = vsel %vm1241_vm1, %v971_v7, %v336_v0 }
  0xdf   : > { %v429_v11 = vmul.f32 0.5, %v421_v62  ;;  %v380_v12 = vpop.permute.xlu1 %379  ;;  %v378_v44 = vpop.permute.xlu0 %377 }
  0xe0   : > { %v428_v45 = vmul.f32 0.5, %v420_v59  ;;  %v388_v58 = vsel %vm385_vm13, %v378_v44, %v380_v12  ;;  %v389_v60 = vsel %vm385_vm13, %v376_v39, %v378_v44 }
  0xe1   : > { %v414_v14 = vsel %vm1236_vm15, %v953_v3, %v389_v60  ;;  %v423_v4 = vsub.f32 %v358_v13, %v388_v58  ;;  %v335_v3 = vsel %vm328_vm9, %v1196_v21, %v1194_v20  ;;  %v329_v21 = vsel %vm328_vm9, %v325_v43, %v327_v32 }
  0xe2   : > { %v543_v18 = vcombine.low %v428_v45, %v429_v11  ;;  %v422_v19 = vsub.f32 %v331_v52, %v414_v14 }
  0xe3   : > { %v431_v22 = vmul.f32 0.5, %v423_v4  ;;  %v384_v23 = vpop.permute.xlu1 %383  ;;  %v382_v5 = vpop.permute.xlu0 %381 }
  0xe4   : > { %551 = vst [vmem:[%s1014_s29 + $0x28] sm:$0xff] %v543_v18  ;;  %v430_v25 = vmul.f32 0.5, %v422_v19  ;;  %v393_v17 = vsel %vm385_vm13, %v384_v23, %v370_v49  ;;  %v386_v26 = vsel %vm385_vm13, %v382_v5, %v384_v23  ;;  %v387_v20 = vsel %vm385_vm13, %v380_v12, %v382_v5 }
  0xe5   : > { %v410_v7 = vsel %vm1265_vm2, %v945_v1, %v393_v17  ;;  %v416_v27 = vsel %vm1272_vm3, %v965_v6, %v387_v20  ;;  %v425_v30 = vsub.f32 %v360_v24, %v386_v26 }
  0xe6   : > { %v544_v31 = vcombine.low %v430_v25, %v431_v22  ;;  %v418_v46 = vsub.f32 %v335_v3, %v410_v7  ;;  %v424_v47 = vsub.f32 %v329_v21, %v416_v27 }
  0xe7   : > { %v433_v28 = vmul.f32 0.5, %v425_v30 }
  0xe8   : > { %552 = vst [vmem:[%s1014_s29 + $0x30] sm:$0xff] %v544_v31  ;;  %v426_v32 = vmul.f32 0.5, %v418_v46  ;;  %v432_v43 = vmul.f32 0.5, %v424_v47 }
  0xea   : > { %v542_v1 = vcombine.low %v426_v32, %v427_v33  ;;  %v545_v48 = vcombine.low %v432_v43, %v433_v28 }
  0xec   : > { %550 = vst [vmem:[%s1014_s29 + $0x20] sm:$0xff] %v542_v1  ;;  %553 = vst [vmem:[%s1014_s29 + $0x38] sm:$0xff] %v545_v48 }
  0xed   : > { %768 = shalt.err (!%p765_p10)
}
  0xee   : > { %s769_s20 = scalar_lea.hbm %s1304_s5, 1536  ;;  %s773_s23 = scalar_lea.hbm %s1344_s1, 3072 }
  0xef   : > { %p770_p2 = scmp.ne.s32.totalorder %s1304_s5, %s769_s20  ;;  %p774_p7 = scmp.lt.s32.totalorder %s1304_s5, %s1344_s1 }
  0xf0   : > { %p775_p0 = scmp.lt.s32.totalorder %s773_s23, %s769_s20 }
  0xf1   : > { %p771_p4 = pnand %p770_p2, %p1410_p12 }
  0xf2   : > { %p776_p6 = por %p775_p0, %p774_p7 }
  0xf3   : > { %p772_p9 = pneg %p771_p4 }
  0xf5   : > { %p777_p11 = pnand %p776_p6, %p772_p9 }
  0xf7   : > { %780 = shalt.err (!%p777_p11)
}
  0xf8   : > { %675 = dma.vmem_to_hbm [thread:$0]  (%p1410_p12), %s590_s2, 1536, %s1304_s5, %s575_s11  }
  0xf9 PF: > { %s601_s17 = sand.u32 1, %s807_s6   ;;  %p1411_p13 = scmp.ne.s32.totalorder %s1350_s19, 0 }
  0xfa   : > { %p1412_p1 = scmp.ge.s32.totalorder %s819_s9, 2  ;;  %s602_s26 = scalar_lea.sflag [#allocation4], %s601_s17 }
  0xfc   : > { %p682_p3 = pnand %p1412_p1, %p1411_p13 }
  0xfe   : > { %p683_p5 = pneg %p682_p3 }
 0x100   : > { %802 = dma.done.wait (%p683_p5), %s602_s26, 1536  }
 0x101   : > { %804 = vsyncadd (%p683_p5), %s602_s26, 4294965760  ;;  %p14_p8 = scmp.ge.s32.totalorder %s862_s12, 4   ;;  %s1413_s6 = smov %s811_s7 }
 0x102   : > { %s1414_s7 = smov %s815_s8  ;;  %s1415_s8 = smov %s874_s15 }
 0x103   : > { %s1416_s9 = smov %s862_s12  ;;  %16 = sbr.rel (!%p14_p8) target bundleno = 5 (0x5), region = 69 }
 0x108   :  { %607 = vsyncpa [#allocation3], 1 }
 0x109   :  { %609 = vsyncpa [#allocation3 + $0x1], 1 }
 0x10a   :  { %610 = vsyncpa [#allocation4], 1 }
 0x10b   :  { %612 = vsyncpa [#allocation4 + $0x1], 1 }

</bundles_post_ra>
